<compile_context>
chip_gen: v7x
topology: tpu7x:2x2x1
jax: 0.10.0
libtpu: 0.0.40
codegen_flags: <defaults>
</compile_context>

<pallas_src>
import functools

import jax
import jax.numpy as jnp
from jax.experimental import pallas as pl
from jax.experimental.pallas import tpu as pltpu


def _round_up(x: int, m: int) -> int:
    return ((x + m - 1) // m) * m


def _fused_expert_kernel(*refs, num_layers: int, compute_dtype):
    """refs = (x_ref, w0, b0, w1, b1, ..., o_ref). All tiles live in VMEM."""
    x_ref = refs[0]
    o_ref = refs[-1]
    wb = refs[1:-1]

    h = x_ref[...]                        # already compute_dtype (host-cast)
    for l in range(num_layers):           # static unroll over layers
        w = wb[2 * l][...]                # compute_dtype, padded on host
        b = wb[2 * l + 1][...]            # f32, (1, Dout_pad) -> broadcasts over batch
        # MXU matmul with f32 accumulation; inputs already in the compute dtype
        # (no-op cast for layer 0 / f32 path).
        y = jnp.dot(h.astype(compute_dtype), w, preferred_element_type=jnp.float32)
        # Bias + ReLU in f32 on the VPU.
        h = jnp.maximum(y + b, 0.0)
        # Dropout in eval mode is identity.
    o_ref[...] = h.astype(o_ref.dtype)


class PallasExpertNetwork:
    """Fused ExpertNetwork forward. Pads + casts the parameters once (cached)."""

    def __init__(self, params, input_dim, *, compute_dtype=jnp.bfloat16,
                 out_dtype=jnp.float32, tile_b=None):
        self.num_layers = len(params)
        self.dims = [input_dim] + [w.shape[1] for (w, _) in params]
        self.pdims = [_round_up(max(d, 128), 128) for d in self.dims]
        self.compute_dtype = jnp.dtype(compute_dtype)
        self.out_dtype = jnp.dtype(out_dtype)
        self.requested_tile_b = tile_b
        # Sublane multiple for the compute dtype: f32 -> 8, bf16 -> 16, fp8 -> 32.
        self.sublane = max(8, 32 // self.compute_dtype.itemsize)

        # Pad + cast weights/biases ONCE on the host (cached across calls).
        padded = []
        for l, (w, b) in enumerate(params):
            di, do = w.shape
            dpi, dpo = self.pdims[l], self.pdims[l + 1]
            wp = jnp.zeros((dpi, dpo), self.compute_dtype)
            wp = wp.at[:di, :do].set(w.astype(self.compute_dtype))
            bp = jnp.zeros((1, dpo), jnp.float32).at[0, :do].set(b.astype(jnp.float32))
            padded += [wp, bp]
        self.padded_wb = tuple(padded)
        self.weight_bytes = sum(int(t.size) * t.dtype.itemsize for t in padded)

    # ---- tile-size selection -------------------------------------------------
    def _pick_tile_b(self, b_pad8: int) -> int:
        tile_b = self.requested_tile_b if self.requested_tile_b is not None else 512
        tile_b = _round_up(max(self.sublane, min(tile_b, b_pad8)), self.sublane)
        # Give v7x's second TensorCore work when the batch is big enough
        # (only split if each half keeps >= 128 rows).
        if tile_b >= b_pad8 and b_pad8 >= 256:
            tile_b = _round_up(b_pad8 // 2, self.sublane)
        # VMEM budget: resident weights + double-buffered activation tiles must fit
        # comfortably (v7x has only 64 MiB VMEM per TensorCore).
        budget = 40 << 20
        while tile_b > self.sublane and \
                self.weight_bytes + self._act_bytes(tile_b) > budget:
            tile_b = max(self.sublane, _round_up(tile_b // 2, self.sublane))
        return tile_b

    def _act_bytes(self, tile_b: int) -> int:
        # double-buffered input tile + double-buffered output tile
        return 2 * tile_b * (self.pdims[0] * self.compute_dtype.itemsize
                             + self.pdims[-1] * self.out_dtype.itemsize)

    # ---- forward ---------------------------------------------------------------
    def __call__(self, x):
        B, Din = x.shape
        assert Din == self.dims[0], "input feature dim mismatch"
        pdims = self.pdims

        b_pad8 = _round_up(max(B, self.sublane), self.sublane)
        tile_b = self._pick_tile_b(b_pad8)
        b_pad = _round_up(b_pad8, tile_b)
        grid = (b_pad // tile_b,)

        # Pad + cast the activations (per call; weights were prepared in __init__).
        xp = jnp.zeros((b_pad, pdims[0]), self.compute_dtype)
        xp = xp.at[:B, :Din].set(x.astype(self.compute_dtype))

        kernel = functools.partial(
            _fused_expert_kernel,
            num_layers=self.num_layers,
            compute_dtype=self.compute_dtype,
        )

        flops = 2 * b_pad * sum(pdims[l] * pdims[l + 1] for l in range(self.num_layers))
        bytes_accessed = (int(xp.size) * xp.dtype.itemsize
                          + self.weight_bytes
                          + b_pad * pdims[-1] * self.out_dtype.itemsize)
        cost = pl.CostEstimate(flops=flops, transcendentals=0,
                               bytes_accessed=bytes_accessed)

        vmem_limit = int(min(
            max(2 * (self.weight_bytes + self._act_bytes(tile_b)) + (4 << 20), 32 << 20),
            64 << 20))  # 64 MiB is valid on every generation (v7x physical ceiling)

        def make_specs(single_buffer_weights: bool):
            in_specs = [pl.BlockSpec((tile_b, pdims[0]), lambda i: (i, 0))]
            wb_kwargs = {}
            if single_buffer_weights:
                # Weights/biases have a constant block index -> one buffer is enough.
                wb_kwargs = dict(pipeline_mode=pl.Buffered(1))
            for l in range(self.num_layers):
                dpi, dpo = pdims[l], pdims[l + 1]
                in_specs.append(pl.BlockSpec((dpi, dpo), lambda i: (0, 0), **wb_kwargs))
                in_specs.append(pl.BlockSpec((1, dpo), lambda i: (0, 0), **wb_kwargs))
            out_specs = pl.BlockSpec((tile_b, pdims[-1]), lambda i: (i, 0))
            return in_specs, out_specs

        def run(single_buffer_weights: bool):
            in_specs, out_specs = make_specs(single_buffer_weights)
            return pl.pallas_call(
                kernel,
                out_shape=jax.ShapeDtypeStruct((b_pad, pdims[-1]), self.out_dtype),
                grid_spec=pltpu.PrefetchScalarGridSpec(
                    num_scalar_prefetch=0,
                    grid=grid,
                    in_specs=in_specs,
                    out_specs=out_specs,
                ),
                compiler_params=pltpu.CompilerParams(
                    dimension_semantics=("parallel",),
                    vmem_limit_bytes=vmem_limit,
                ),
                cost_estimate=cost,
            )(xp, *self.padded_wb)

        try:
            out = run(True)
        except Exception:
            # Older jax builds without pipeline_mode support on top-level BlockSpecs.
            out = run(False)

        return out[:B, : self.dims[-1]]


def init_expert_params(key, input_dim, expert_hidden_dims, dtype=jnp.float32):
    """Deterministic init mimicking nn.Linear's uniform(-1/sqrt(fan_in), 1/sqrt(fan_in)).

    Returns [(w, b), ...] with w:(Din_l, Dout_l) (transpose of torch's weight) so y = x@w + b.
    """
    params = []
    prev = input_dim
    for h in expert_hidden_dims:
        key, kw, kb = jax.random.split(key, 3)
        bound = 1.0 / jnp.sqrt(jnp.array(prev, dtype=jnp.float32))
        w = jax.random.uniform(kw, (prev, h), dtype, -bound, bound)
        b = jax.random.uniform(kb, (h,), dtype, -bound, bound)
        params.append((w, b))
        prev = h
    return params


if __name__ == "__main__":
    key = jax.random.PRNGKey(0)
    batch = 2
    input_dim = 32
    expert_hidden_dims = [64, 32]

    kx, kp = jax.random.split(key)
    x = jax.random.normal(kx, (batch, input_dim), dtype=jnp.float32)
    params = init_expert_params(kp, input_dim, expert_hidden_dims)

    # Plain-JAX reference of the same math (Linear -> ReLU -> Dropout(eval)=identity).
    ref = x
    for w, b in params:
        ref = jnp.maximum(ref @ w + b[None, :], 0.0)

    # 1) f32 compute path: exact-math check against the reference.
    net_f32 = PallasExpertNetwork(params, input_dim, compute_dtype=jnp.float32)
    out_f32 = jax.block_until_ready(net_f32(x))
    assert out_f32.shape == (batch, expert_hidden_dims[-1])
    assert jnp.allclose(out_f32, ref, atol=1e-5, rtol=1e-5)

    # 2) Default bf16 MXU path: looser tolerance (bf16 has ~8 mantissa bits).
    net_bf16 = PallasExpertNetwork(params, input_dim)  # compute_dtype=bfloat16 default
    out_bf16 = jax.block_until_ready(net_bf16(x))
    assert out_bf16.shape == (batch, expert_hidden_dims[-1])
    assert jnp.allclose(out_bf16, ref, atol=5e-2, rtol=5e-2)

    print("KERNEL_OK")
</pallas_src>

<mosaic_0001>
module attributes {stable_mosaic.version = 11 : i64} {
  func.func @_fused_expert_kernel(%arg0: i32, %arg1: memref<8x128xf32, #tpu.memory_space<vmem>>, %arg2: memref<128x128xf32, #tpu.memory_space<vmem>>, %arg3: memref<1x128xf32, #tpu.memory_space<vmem>>, %arg4: memref<128x128xf32, #tpu.memory_space<vmem>>, %arg5: memref<1x128xf32, #tpu.memory_space<vmem>>, %arg6: memref<8x128xf32, #tpu.memory_space<vmem>>) attributes {dimension_semantics = [#tpu.dimension_semantics<parallel>], iteration_bounds = array<i64: 1>, scalar_prefetch = 0 : i64, scratch_operands = 0 : i64, tpu.core_type = #tpu.core_type<tc>, window_params = [{transform_indices = @transform_0, window_bounds = array<i64: 8, 128>}, {pipeline_mode = #tpu.pipeline_mode<synchronous>, transform_indices = @transform_1, window_bounds = array<i64: 128, 128>}, {pipeline_mode = #tpu.pipeline_mode<synchronous>, transform_indices = @transform_2, window_bounds = array<i64: 1, 128>}, {pipeline_mode = #tpu.pipeline_mode<synchronous>, transform_indices = @transform_3, window_bounds = array<i64: 128, 128>}, {pipeline_mode = #tpu.pipeline_mode<synchronous>, transform_indices = @transform_4, window_bounds = array<i64: 1, 128>}, {transform_indices = @transform_5, window_bounds = array<i64: 8, 128>}]} {
    %c0 = arith.constant 0 : index
    %c0_0 = arith.constant 0 : index
    %0 = vector.load %arg1[%c0, %c0_0] : memref<8x128xf32, #tpu.memory_space<vmem>>, vector<8x128xf32>
    %c0_1 = arith.constant 0 : index
    %c0_2 = arith.constant 0 : index
    %1 = vector.load %arg2[%c0_1, %c0_2] : memref<128x128xf32, #tpu.memory_space<vmem>>, vector<128x128xf32>
    %c0_3 = arith.constant 0 : index
    %c0_4 = arith.constant 0 : index
    %2 = vector.load %arg3[%c0_3, %c0_4] : memref<1x128xf32, #tpu.memory_space<vmem>>, vector<1x128xf32>
    %cst = arith.constant dense<0.000000e+00> : vector<8x128xf32>
    %3 = tpu.matmul %0, %1, %cst {dimension_numbers = #tpu.dot_dimension_numbers<[1], [0], [0], [1], [0, 0, 1, 1], [], []>} : vector<8x128xf32>, vector<128x128xf32>, vector<8x128xf32> -> vector<8x128xf32>
    %4 = vector.broadcast %2 : vector<1x128xf32> to vector<8x128xf32>
    %5 = arith.addf %3, %4 : vector<8x128xf32>
    %cst_5 = arith.constant 0.000000e+00 : f32
    %6 = vector.broadcast %cst_5 : f32 to vector<8x128xf32>
    %7 = arith.maximumf %5, %6 : vector<8x128xf32>
    %c0_6 = arith.constant 0 : index
    %c0_7 = arith.constant 0 : index
    %8 = vector.load %arg4[%c0_6, %c0_7] : memref<128x128xf32, #tpu.memory_space<vmem>>, vector<128x128xf32>
    %c0_8 = arith.constant 0 : index
    %c0_9 = arith.constant 0 : index
    %9 = vector.load %arg5[%c0_8, %c0_9] : memref<1x128xf32, #tpu.memory_space<vmem>>, vector<1x128xf32>
    %cst_10 = arith.constant dense<0.000000e+00> : vector<8x128xf32>
    %10 = tpu.matmul %7, %8, %cst_10 {dimension_numbers = #tpu.dot_dimension_numbers<[1], [0], [0], [1], [0, 0, 1, 1], [], []>} : vector<8x128xf32>, vector<128x128xf32>, vector<8x128xf32> -> vector<8x128xf32>
    %11 = vector.broadcast %9 : vector<1x128xf32> to vector<8x128xf32>
    %12 = arith.addf %10, %11 : vector<8x128xf32>
    %cst_11 = arith.constant 0.000000e+00 : f32
    %13 = vector.broadcast %cst_11 : f32 to vector<8x128xf32>
    %14 = arith.maximumf %12, %13 : vector<8x128xf32>
    %c0_12 = arith.constant 0 : index
    %c0_13 = arith.constant 0 : index
    %15 = vector.load %arg6[%c0_12, %c0_13] : memref<8x128xf32, #tpu.memory_space<vmem>>, vector<8x128xf32>
    tpu.vector_store %arg6[%c0_12, %c0_13], %14 {strides = array<i32>} : memref<8x128xf32, #tpu.memory_space<vmem>>, vector<8x128xf32>,
    return
  }
  func.func @transform_0(%arg0: i32) -> (i32, i32) {
    %c0_i32 = arith.constant 0 : i32
    %c0_i32_0 = arith.constant 0 : i32
    return %arg0, %c0_i32 : i32, i32
  }
  func.func @transform_1(%arg0: i32) -> (i32, i32) {
    %c0_i32 = arith.constant 0 : i32
    %c0_i32_0 = arith.constant 0 : i32
    %c0_i32_1 = arith.constant 0 : i32
    return %c0_i32, %c0_i32_0 : i32, i32
  }
  func.func @transform_2(%arg0: i32) -> (i32, i32) {
    %c0_i32 = arith.constant 0 : i32
    %c0_i32_0 = arith.constant 0 : i32
    %c0_i32_1 = arith.constant 0 : i32
    return %c0_i32, %c0_i32_0 : i32, i32
  }
  func.func @transform_3(%arg0: i32) -> (i32, i32) {
    %c0_i32 = arith.constant 0 : i32
    %c0_i32_0 = arith.constant 0 : i32
    %c0_i32_1 = arith.constant 0 : i32
    return %c0_i32, %c0_i32_0 : i32, i32
  }
  func.func @transform_4(%arg0: i32) -> (i32, i32) {
    %c0_i32 = arith.constant 0 : i32
    %c0_i32_0 = arith.constant 0 : i32
    %c0_i32_1 = arith.constant 0 : i32
    return %c0_i32, %c0_i32_0 : i32, i32
  }
  func.func @transform_5(%arg0: i32) -> (i32, i32) {
    %c0_i32 = arith.constant 0 : i32
    %c0_i32_0 = arith.constant 0 : i32
    return %arg0, %c0_i32 : i32, i32
  }
}

module attributes {stable_mosaic.version = 11 : i64} {
  func.func @_fused_expert_kernel(%arg0: i32, %arg1: memref<8x128xf32, #tpu.memory_space<vmem>>, %arg2: memref<128x128xf32, #tpu.memory_space<vmem>>, %arg3: memref<1x128xf32, #tpu.memory_space<vmem>>, %arg4: memref<128x128xf32, #tpu.memory_space<vmem>>, %arg5: memref<1x128xf32, #tpu.memory_space<vmem>>, %arg6: memref<8x128xf32, #tpu.memory_space<vmem>>) attributes {dimension_semantics = [#tpu.dimension_semantics<parallel>], iteration_bounds = array<i64: 1>, scalar_prefetch = 0 : i64, scratch_operands = 0 : i64, tpu.core_type = #tpu.core_type<tc>, window_params = [{transform_indices = @transform_0, window_bounds = array<i64: 8, 128>}, {pipeline_mode = #tpu.pipeline_mode<synchronous>, transform_indices = @transform_1, window_bounds = array<i64: 128, 128>}, {pipeline_mode = #tpu.pipeline_mode<synchronous>, transform_indices = @transform_2, window_bounds = array<i64: 1, 128>}, {pipeline_mode = #tpu.pipeline_mode<synchronous>, transform_indices = @transform_3, window_bounds = array<i64: 128, 128>}, {pipeline_mode = #tpu.pipeline_mode<synchronous>, transform_indices = @transform_4, window_bounds = array<i64: 1, 128>}, {transform_indices = @transform_5, window_bounds = array<i64: 8, 128>}]} {
    %c0 = arith.constant 0 : index
    %c0_0 = arith.constant 0 : index
    %0 = vector.load %arg1[%c0, %c0_0] : memref<8x128xf32, #tpu.memory_space<vmem>>, vector<8x128xf32>
    %c0_1 = arith.constant 0 : index
    %c0_2 = arith.constant 0 : index
    %1 = vector.load %arg2[%c0_1, %c0_2] : memref<128x128xf32, #tpu.memory_space<vmem>>, vector<128x128xf32>
    %c0_3 = arith.constant 0 : index
    %c0_4 = arith.constant 0 : index
    %2 = vector.load %arg3[%c0_3, %c0_4] : memref<1x128xf32, #tpu.memory_space<vmem>>, vector<1x128xf32>
    %cst = arith.constant dense<0.000000e+00> : vector<8x128xf32>
    %3 = tpu.matmul %0, %1, %cst {dimension_numbers = #tpu.dot_dimension_numbers<[1], [0], [0], [1], [0, 0, 1, 1], [], []>} : vector<8x128xf32>, vector<128x128xf32>, vector<8x128xf32> -> vector<8x128xf32>
    %4 = vector.broadcast %2 : vector<1x128xf32> to vector<8x128xf32>
    %5 = arith.addf %3, %4 : vector<8x128xf32>
    %cst_5 = arith.constant 0.000000e+00 : f32
    %6 = vector.broadcast %cst_5 : f32 to vector<8x128xf32>
    %7 = arith.maximumf %5, %6 : vector<8x128xf32>
    %c0_6 = arith.constant 0 : index
    %c0_7 = arith.constant 0 : index
    %8 = vector.load %arg4[%c0_6, %c0_7] : memref<128x128xf32, #tpu.memory_space<vmem>>, vector<128x128xf32>
    %c0_8 = arith.constant 0 : index
    %c0_9 = arith.constant 0 : index
    %9 = vector.load %arg5[%c0_8, %c0_9] : memref<1x128xf32, #tpu.memory_space<vmem>>, vector<1x128xf32>
    %cst_10 = arith.constant dense<0.000000e+00> : vector<8x128xf32>
    %10 = tpu.matmul %7, %8, %cst_10 {dimension_numbers = #tpu.dot_dimension_numbers<[1], [0], [0], [1], [0, 0, 1, 1], [], []>} : vector<8x128xf32>, vector<128x128xf32>, vector<8x128xf32> -> vector<8x128xf32>
    %11 = vector.broadcast %9 : vector<1x128xf32> to vector<8x128xf32>
    %12 = arith.addf %10, %11 : vector<8x128xf32>
    %cst_11 = arith.constant 0.000000e+00 : f32
    %13 = vector.broadcast %cst_11 : f32 to vector<8x128xf32>
    %14 = arith.maximumf %12, %13 : vector<8x128xf32>
    %c0_12 = arith.constant 0 : index
    %c0_13 = arith.constant 0 : index
    %15 = vector.load %arg6[%c0_12, %c0_13] : memref<8x128xf32, #tpu.memory_space<vmem>>, vector<8x128xf32>
    tpu.vector_store %arg6[%c0_12, %c0_13], %14 {strides = array<i32>} : memref<8x128xf32, #tpu.memory_space<vmem>>, vector<8x128xf32>,
    return
  }
  func.func @transform_0(%arg0: i32) -> (i32, i32) {
    %c0_i32 = arith.constant 0 : i32
    %c0_i32_0 = arith.constant 0 : i32
    return %arg0, %c0_i32 : i32, i32
  }
  func.func @transform_1(%arg0: i32) -> (i32, i32) {
    %c0_i32 = arith.constant 0 : i32
    %c0_i32_0 = arith.constant 0 : i32
    %c0_i32_1 = arith.constant 0 : i32
    return %c0_i32, %c0_i32_0 : i32, i32
  }
  func.func @transform_2(%arg0: i32) -> (i32, i32) {
    %c0_i32 = arith.constant 0 : i32
    %c0_i32_0 = arith.constant 0 : i32
    %c0_i32_1 = arith.constant 0 : i32
    return %c0_i32, %c0_i32_0 : i32, i32
  }
  func.func @transform_3(%arg0: i32) -> (i32, i32) {
    %c0_i32 = arith.constant 0 : i32
    %c0_i32_0 = arith.constant 0 : i32
    %c0_i32_1 = arith.constant 0 : i32
    return %c0_i32, %c0_i32_0 : i32, i32
  }
  func.func @transform_4(%arg0: i32) -> (i32, i32) {
    %c0_i32 = arith.constant 0 : i32
    %c0_i32_0 = arith.constant 0 : i32
    %c0_i32_1 = arith.constant 0 : i32
    return %c0_i32, %c0_i32_0 : i32, i32
  }
  func.func @transform_5(%arg0: i32) -> (i32, i32) {
    %c0_i32 = arith.constant 0 : i32
    %c0_i32_0 = arith.constant 0 : i32
    return %arg0, %c0_i32 : i32, i32
  }
}

</mosaic_0001>

<bundles_post_ra>
// kernel: tpu_custom_call.1
= control target key start
LH: loop header
LB: loop body
LE: loop exit
PB: predicated region body
PF: predicated region fallthrough
CT: control target
= control target key end

     0   :  { %10 = vsyncpa [#allocation3], 0  ;;  %s638_s0 = inlined_call_operand.hbm [shape: f32[8,128], index: 0, kind: input, shape index: {}]   ;;  %s639_s1 = inlined_call_operand.hbm [shape: f32[128,128], index: 1, kind: input, shape index: {}]   ;;  %s640_s2 = inlined_call_operand.vmem [shape: f32[1,128], index: 2, kind: input, shape index: {}]   ;;  %s641_s3 = inlined_call_operand.hbm [shape: f32[128,128], index: 3, kind: input, shape index: {}]   ;;  %s642_s4 = inlined_call_operand.vmem [shape: f32[1,128], index: 4, kind: input, shape index: {}]   ;;  %s643_s5 = inlined_call_operand.hbm [shape: f32[8,128], index: 5, kind: output, shape index: {}]  }
   0x1   :  { %11 = vsyncpa [#allocation6], 0 }
   0x2   :  { %12 = vsyncpa [#allocation4], 0  ;;  %s523_s18 = smov [#allocation5]   ;;  %s429_s22 = scalar_lea.hbm %s639_s1, 2048 }
   0x3   :  { %s28_s19 = sshll.u32 %s523_s18, 4  ;;  %p430_p0 = scmp.ne.s32.totalorder %s639_s1, %s429_s22  ;;  %s29_s19 = int_to_ptr.vmem [resolvable:$true] %s28_s19 }
   0x4   :  { %p433_p1 = scmp.lt.u32.totalorder %s429_s22, %s639_s1 }
   0x6   :  { %p435_p2 = pnand %p433_p1, %p430_p0 }
   0x8   :  { %438 = shalt.err (!%p435_p2)
}
   0x9   :  { %s439_s27 = scalar_lea.vmem %s29_s19, 2048  ;;  %p444_p4 = scmp.lt.s32.totalorder %s29_s19, %s29_s19 }
   0xa   :  { %p440_p3 = scmp.ne.s32.totalorder %s29_s19, %s439_s27  ;;  %p445_p5 = scmp.lt.s32.totalorder %s439_s27, %s439_s27 }
   0xc   :  { %p446_p6 = por %p445_p5, %p444_p4 }
   0xe   :  { %p447_p7 = pnand %p446_p6, %p440_p3 }
  0x10   :  { %450 = shalt.err (!%p447_p7)
}
  0x11   :  { %s524_s28 = smov 128   ;;  %s525_s29 = smov 8  }
  0x12   :  { %34 = dma.hbm_to_vmem [thread:$0]  %s639_s1, 2048, %s29_s19, [#allocation6], %s524_s28, %s524_s28, %s525_s29  }
  0x13   :  { %s526_s7 = smov [#allocation2]   ;;  %s527_s9 = smov [#allocation7]  }
  0x14   :  { %s19_s8 = sshll.u32 %s526_s7, 4  ;;  %s42_s10 = sshll.u32 %s527_s9, 4  ;;  %s20_s8 = int_to_ptr.vmem [resolvable:$true] %s19_s8  ;;  %s43_s10 = int_to_ptr.vmem [resolvable:$true] %s42_s10 }
  0x15   :  { %s451_s13 = scalar_lea.hbm %s638_s0, 128 }
  0x16   :  { %p452_p8 = scmp.ne.s32.totalorder %s638_s0, %s451_s13  ;;  %p455_p9 = scmp.lt.u32.totalorder %s451_s13, %s638_s0 }
  0x18   :  { %p457_p10 = pnand %p455_p9, %p452_p8 }
  0x1a   :  { %460 = shalt.err (!%p457_p10)
}
  0x1b   :  { %s461_s1 = scalar_lea.vmem %s20_s8, 128  ;;  %p466_p12 = scmp.lt.s32.totalorder %s20_s8, %s20_s8 }
  0x1c   :  { %p462_p11 = scmp.ne.s32.totalorder %s20_s8, %s461_s1  ;;  %p467_p13 = scmp.lt.s32.totalorder %s461_s1, %s461_s1 }
  0x1e   :  { %p468_p0 = por %p467_p13, %p466_p12 }
  0x20   :  { %p469_p1 = pnand %p468_p0, %p462_p11 }
  0x22   :  { %472 = shalt.err (!%p469_p1)
}
  0x23   :  { %22 = dma.hbm_to_vmem [thread:$0]  %s638_s0, 128, %s20_s8, [#allocation3]  }
  0x24   :  { %s473_s22 = scalar_lea.hbm %s641_s3, 2048 }
  0x25   :  { %p474_p2 = scmp.ne.s32.totalorder %s641_s3, %s473_s22  ;;  %p477_p3 = scmp.lt.u32.totalorder %s473_s22, %s641_s3 }
  0x27   :  { %p479_p4 = pnand %p477_p3, %p474_p2 }
  0x29   :  { %482 = shalt.err (!%p479_p4)
}
  0x2a   :  { %s483_s27 = scalar_lea.vmem %s43_s10, 2048  ;;  %p488_p6 = scmp.lt.s32.totalorder %s43_s10, %s43_s10 }
  0x2b   :  { %p484_p5 = scmp.ne.s32.totalorder %s43_s10, %s483_s27  ;;  %p489_p7 = scmp.lt.s32.totalorder %s483_s27, %s483_s27 }
  0x2d   :  { %p490_p8 = por %p489_p7, %p488_p6 }
  0x2f   :  { %p491_p9 = pnand %p490_p8, %p484_p5 }
  0x31   :  { %494 = shalt.err (!%p491_p9)
}
  0x32   :  { %48 = dma.hbm_to_vmem [thread:$0]  %s641_s3, 2048, %s43_s10, [#allocation6], %s524_s28, %s524_s28, %s525_s29  }
  0x33   :  { %517 = dma.done.wait [#allocation3], 128  }
  0x34   :  { %518 = vsyncadd [#allocation3], 4294967168 }
  0x35   :  { %519 = dma.done.wait [#allocation6], 4096  }
  0x36   :  { %520 = vsyncadd [#allocation6], 4294963200  ;;  %v528_v0 = vmov 0.0|0.0   ;;  %vm529_vm0 = vmmov 0   ;;  %v530_v1 = vmov 0.0   ;;  %v61_v2 = vld [vmem:[#allocation5] sm:$0xff] }
  0x37   :  { %372 = vmatprep.subr.bf16.mxu0 %v528_v0  ;;  %334 = vmatprep.mubr.msk.f32.mxu0 %vm529_vm0, %v530_v1  ;;  %v62_v3 = vld [vmem:[#allocation5 + $0x8] sm:$0xff]  ;;  %v63_v4 = vld [vmem:[#allocation5 + $0x10] sm:$0xff]  ;;  %v64_v6 = vld [vmem:[#allocation5 + $0x18] sm:$0xff]  ;;  %s531_s7 = smov [#allocation8]  }
  0x38   :  { %396 = vmatprep.subr.bf16.mxu1 %v528_v0  ;;  %369 = vmatprep.mubr.msk.f32.mxu1 %vm529_vm0, %v530_v1  ;;  %v373_v5 = vpack.c.bf16 %v62_v3, %v61_v2  ;;  %v376_v7 = vpack.c.bf16 %v64_v6, %v63_v4  ;;  %v65_v8 = vld [vmem:[#allocation5 + $0x20] sm:$0xff]  ;;  %v66_v9 = vld [vmem:[#allocation5 + $0x28] sm:$0xff]  ;;  %v157_v12 = vld [vmem:[#allocation7 + $0x10] sm:$0xff]  ;;  %s256_s8 = sshll.u32 %s531_s7, 4  ;;  %s257_s8 = int_to_ptr.vmem [resolvable:$true] %s256_s8 }
  0x39   :  { %v155_v10 = vld [vmem:[#allocation7] sm:$0xff]  ;;  %v156_v11 = vld [vmem:[#allocation7 + $0x8] sm:$0xff]  ;;  %v158_v13 = vld [vmem:[#allocation7 + $0x18] sm:$0xff]  ;;  %v379_v14 = vpack.c.bf16 %v66_v9, %v65_v8  ;;  %s495_s9 = scalar_lea.vmem %s257_s8, 128  ;;  %p500_p11 = scmp.lt.s32.totalorder %s257_s8, %s257_s8 }
  0x3a   :  { %374 = vmatpush3.bf16.msra.mxu0 %v373_v5  ;;  %v397_v15 = vpack.c.bf16 %v156_v11, %v155_v10  ;;  %v67_v16 = vld [vmem:[#allocation5 + $0x30] sm:$0xff]  ;;  %v68_v17 = vld [vmem:[#allocation5 + $0x38] sm:$0xff]  ;;  %v400_v18 = vpack.c.bf16 %v158_v13, %v157_v12  ;;  %v159_v19 = vld [vmem:[#allocation7 + $0x20] sm:$0xff]  ;;  %p496_p10 = scmp.ne.s32.totalorder %s257_s8, %s495_s9  ;;  %p501_p12 = scmp.lt.s32.totalorder %s495_s9, %s495_s9 }
  0x3b   :  { %375 = vmatprep.subr.bf16.mxu0 %v528_v0  ;;  %v160_v20 = vld [vmem:[#allocation7 + $0x28] sm:$0xff]  ;;  %v382_v21 = vpack.c.bf16 %v68_v17, %v67_v16  ;;  %v69_v22 = vld [vmem:[#allocation5 + $0x40] sm:$0xff]  ;;  %v161_v25 = vld [vmem:[#allocation7 + $0x30] sm:$0xff] }
  0x3c   :  { %398 = vmatpush3.bf16.msra.mxu1 %v397_v15  ;;  %v70_v23 = vld [vmem:[#allocation5 + $0x48] sm:$0xff]  ;;  %v403_v24 = vpack.c.bf16 %v160_v20, %v159_v19  ;;  %v162_v26 = vld [vmem:[#allocation7 + $0x38] sm:$0xff]  ;;  %v71_v28 = vld [vmem:[#allocation5 + $0x50] sm:$0xff]  ;;  %p502_p13 = por %p501_p12, %p500_p11 }
  0x3d   :  { %399 = vmatprep.subr.bf16.mxu1 %v528_v0  ;;  %v385_v27 = vpack.c.bf16 %v70_v23, %v69_v22  ;;  %v72_v29 = vld [vmem:[#allocation5 + $0x58] sm:$0xff]  ;;  %v406_v30 = vpack.c.bf16 %v162_v26, %v161_v25  ;;  %v163_v31 = vld [vmem:[#allocation7 + $0x40] sm:$0xff]  ;;  %v164_v32 = vld [vmem:[#allocation7 + $0x48] sm:$0xff] }
  0x3e   :  { %377 = vmatpush3.bf16.msra.mxu0 %v376_v7  ;;  %v388_v33 = vpack.c.bf16 %v72_v29, %v71_v28  ;;  %v73_v34 = vld [vmem:[#allocation5 + $0x60] sm:$0xff]  ;;  %v74_v35 = vld [vmem:[#allocation5 + $0x68] sm:$0xff]  ;;  %v409_v36 = vpack.c.bf16 %v164_v32, %v163_v31  ;;  %v165_v37 = vld [vmem:[#allocation7 + $0x50] sm:$0xff]  ;;  %p503_p0 = pnand %p502_p13, %p496_p10 }
  0x3f   :  { %378 = vmatprep.subr.bf16.mxu0 %v528_v0  ;;  %v166_v38 = vld [vmem:[#allocation7 + $0x58] sm:$0xff]  ;;  %v391_v39 = vpack.c.bf16 %v74_v35, %v73_v34  ;;  %v75_v40 = vld [vmem:[#allocation5 + $0x70] sm:$0xff]  ;;  %v167_v43 = vld [vmem:[#allocation7 + $0x60] sm:$0xff] }
  0x40   :  { %401 = vmatpush3.bf16.msra.mxu1 %v400_v18  ;;  %v76_v41 = vld [vmem:[#allocation5 + $0x78] sm:$0xff]  ;;  %v412_v42 = vpack.c.bf16 %v166_v38, %v165_v37  ;;  %v168_v44 = vld [vmem:[#allocation7 + $0x68] sm:$0xff]  ;;  %v169_v48 = vld [vmem:[#allocation7 + $0x70] sm:$0xff] }
  0x41   :  { %402 = vmatprep.subr.bf16.mxu1 %v528_v0  ;;  %v394_v45 = vpack.c.bf16 %v76_v41, %v75_v40  ;;  %v415_v46 = vpack.c.bf16 %v168_v44, %v167_v43  ;;  %v60_v47 = vld [vmem:[#allocation2] sm:$0xff] }
  0x42   :  { %380 = vmatpush3.bf16.msra.mxu0 %v379_v14  ;;  %v170_v49 = vld [vmem:[#allocation7 + $0x78] sm:$0xff] }
  0x43   :  { %381 = vmatprep.subr.bf16.mxu0 %v528_v0  ;;  %v418_v50 = vpack.c.bf16 %v170_v49, %v169_v48  ;;  %v266_v51 = vld [vmem:[%s640_s2] ss:$0 sm:$0xff] }
  0x44   :  { %404 = vmatpush3.bf16.msra.mxu1 %v403_v24  ;;  %v267_v56 = vld [vmem:[%s642_s4] ss:$0 sm:$0xff] }
  0x45   :  { %405 = vmatprep.subr.bf16.mxu1 %v528_v0 }
  0x46   :  { %383 = vmatpush3.bf16.msra.mxu0 %v382_v21 }
  0x47   :  { %384 = vmatprep.subr.bf16.mxu0 %v528_v0 }
  0x48   :  { %407 = vmatpush3.bf16.msra.mxu1 %v406_v30 }
  0x49   :  { %408 = vmatprep.subr.bf16.mxu1 %v528_v0 }
  0x4a   :  { %386 = vmatpush3.bf16.msra.mxu0 %v385_v27 }
  0x4b   :  { %387 = vmatprep.subr.bf16.mxu0 %v528_v0 }
  0x4c   :  { %410 = vmatpush3.bf16.msra.mxu1 %v409_v36 }
  0x4d   :  { %411 = vmatprep.subr.bf16.mxu1 %v528_v0 }
  0x4e   :  { %389 = vmatpush3.bf16.msra.mxu0 %v388_v33 }
  0x4f   :  { %390 = vmatprep.subr.bf16.mxu0 %v528_v0 }
  0x50   :  { %413 = vmatpush3.bf16.msra.mxu1 %v412_v42 }
  0x51   :  { %414 = vmatprep.subr.bf16.mxu1 %v528_v0 }
  0x52   :  { %392 = vmatpush3.bf16.msra.mxu0 %v391_v39 }
  0x53   :  { %393 = vmatprep.subr.bf16.mxu0 %v528_v0 }
  0x54   :  { %416 = vmatpush3.bf16.msra.mxu1 %v415_v46 }
  0x55   :  { %417 = vmatprep.subr.bf16.mxu1 %v528_v0 }
  0x56   :  { %395 = vmatpush3.bf16.msra.mxu0 %v394_v45 }
  0x58   :  { %419 = vmatpush3.bf16.msra.mxu1 %v418_v50 }
  0x59   :  { %335 = vmatmul.mubr.f32.vlgmr.msra.gmra.mrb[0].mxu0 %v60_v47 }
 0x12c   :  { %v150_v52 = vpop.f32.mrb[0].mxu0 }
 0x12d   :  { %v151_v53 = vadd.f32 %v266_v51, %v150_v52  ;;  %v336_v54 = vpop.f32.mrb[1].mxu0 }
 0x12f   :  { %v154_v55 = vmax.f32 %v151_v53, 0.0 }
 0x131   :  { %370 = vmatmul.mubr.f32.vlgmr.msra.gmra.mrb[0].mxu1 %v154_v55 }
 0x204   :  { %v244_v57 = vpop.f32.mrb[0].mxu1 }
 0x205   :  { %v245_v58 = vadd.f32 %v267_v56, %v244_v57  ;;  %v371_v59 = vpop.f32.mrb[1].mxu1 }
 0x207   :  { %v248_v60 = vmax.f32 %v245_v58, 0.0 }
 0x209   :  { %249 = vst [vmem:[#allocation8] sm:$0xff] %v248_v60 }
 0x20a   :  { %506 = shalt.err (!%p503_p0)
}
 0x20b   :  { %s507_s11 = scalar_lea.hbm %s643_s5, 128 }
 0x20c   :  { %p508_p1 = scmp.ne.s32.totalorder %s643_s5, %s507_s11  ;;  %p511_p2 = scmp.lt.u32.totalorder %s507_s11, %s643_s5 }
 0x20e   :  { %p513_p3 = pnand %p511_p2, %p508_p1 }
 0x210   :  { %516 = shalt.err (!%p513_p3)
}
 0x211   :  { %259 = dma.vmem_to_hbm [thread:$0]  %s257_s8, 128, %s643_s5, [#allocation4]  }
 0x212   :  { %521 = dma.done.wait [#allocation4], 128  }
 0x213   :  { %522 = vsyncadd [#allocation4], 4294967168 }
 0x214   :  { %263 = vsyncpa [#allocation3], 1 }
 0x215   :  { %264 = vsyncpa [#allocation6], 1 }
 0x216   :  { %265 = vsyncpa [#allocation4], 1 }

// kernel: tpu_custom_call.1
= control target key start
LH: loop header
LB: loop body
LE: loop exit
PB: predicated region body
PF: predicated region fallthrough
CT: control target
= control target key end

     0   :  { %10 = vsyncpa [#allocation3], 0  ;;  %s638_s0 = inlined_call_operand.hbm [shape: f32[8,128], index: 0, kind: input, shape index: {}]   ;;  %s639_s1 = inlined_call_operand.hbm [shape: f32[128,128], index: 1, kind: input, shape index: {}]   ;;  %s640_s2 = inlined_call_operand.vmem [shape: f32[1,128], index: 2, kind: input, shape index: {}]   ;;  %s641_s3 = inlined_call_operand.hbm [shape: f32[128,128], index: 3, kind: input, shape index: {}]   ;;  %s642_s4 = inlined_call_operand.vmem [shape: f32[1,128], index: 4, kind: input, shape index: {}]   ;;  %s643_s5 = inlined_call_operand.hbm [shape: f32[8,128], index: 5, kind: output, shape index: {}]  }
   0x1   :  { %11 = vsyncpa [#allocation6], 0 }
   0x2   :  { %12 = vsyncpa [#allocation4], 0  ;;  %s523_s18 = smov [#allocation5]   ;;  %s429_s22 = scalar_lea.hbm %s639_s1, 2048 }
   0x3   :  { %s28_s19 = sshll.u32 %s523_s18, 4  ;;  %p430_p0 = scmp.ne.s32.totalorder %s639_s1, %s429_s22  ;;  %s29_s19 = int_to_ptr.vmem [resolvable:$true] %s28_s19 }
   0x4   :  { %p433_p1 = scmp.lt.u32.totalorder %s429_s22, %s639_s1 }
   0x6   :  { %p435_p2 = pnand %p433_p1, %p430_p0 }
   0x8   :  { %438 = shalt.err (!%p435_p2)
}
   0x9   :  { %s439_s27 = scalar_lea.vmem %s29_s19, 2048  ;;  %p444_p4 = scmp.lt.s32.totalorder %s29_s19, %s29_s19 }
   0xa   :  { %p440_p3 = scmp.ne.s32.totalorder %s29_s19, %s439_s27  ;;  %p445_p5 = scmp.lt.s32.totalorder %s439_s27, %s439_s27 }
   0xc   :  { %p446_p6 = por %p445_p5, %p444_p4 }
   0xe   :  { %p447_p7 = pnand %p446_p6, %p440_p3 }
  0x10   :  { %450 = shalt.err (!%p447_p7)
}
  0x11   :  { %s524_s28 = smov 128   ;;  %s525_s29 = smov 8  }
  0x12   :  { %34 = dma.hbm_to_vmem [thread:$0]  %s639_s1, 2048, %s29_s19, [#allocation6], %s524_s28, %s524_s28, %s525_s29  }
  0x13   :  { %s526_s7 = smov [#allocation2]   ;;  %s527_s9 = smov [#allocation7]  }
  0x14   :  { %s19_s8 = sshll.u32 %s526_s7, 4  ;;  %s42_s10 = sshll.u32 %s527_s9, 4  ;;  %s20_s8 = int_to_ptr.vmem [resolvable:$true] %s19_s8  ;;  %s43_s10 = int_to_ptr.vmem [resolvable:$true] %s42_s10 }
  0x15   :  { %s451_s13 = scalar_lea.hbm %s638_s0, 128 }
  0x16   :  { %p452_p8 = scmp.ne.s32.totalorder %s638_s0, %s451_s13  ;;  %p455_p9 = scmp.lt.u32.totalorder %s451_s13, %s638_s0 }
  0x18   :  { %p457_p10 = pnand %p455_p9, %p452_p8 }
  0x1a   :  { %460 = shalt.err (!%p457_p10)
}
  0x1b   :  { %s461_s1 = scalar_lea.vmem %s20_s8, 128  ;;  %p466_p12 = scmp.lt.s32.totalorder %s20_s8, %s20_s8 }
  0x1c   :  { %p462_p11 = scmp.ne.s32.totalorder %s20_s8, %s461_s1  ;;  %p467_p13 = scmp.lt.s32.totalorder %s461_s1, %s461_s1 }
  0x1e   :  { %p468_p0 = por %p467_p13, %p466_p12 }
  0x20   :  { %p469_p1 = pnand %p468_p0, %p462_p11 }
  0x22   :  { %472 = shalt.err (!%p469_p1)
}
  0x23   :  { %22 = dma.hbm_to_vmem [thread:$0]  %s638_s0, 128, %s20_s8, [#allocation3]  }
  0x24   :  { %s473_s22 = scalar_lea.hbm %s641_s3, 2048 }
  0x25   :  { %p474_p2 = scmp.ne.s32.totalorder %s641_s3, %s473_s22  ;;  %p477_p3 = scmp.lt.u32.totalorder %s473_s22, %s641_s3 }
  0x27   :  { %p479_p4 = pnand %p477_p3, %p474_p2 }
  0x29   :  { %482 = shalt.err (!%p479_p4)
}
  0x2a   :  { %s483_s27 = scalar_lea.vmem %s43_s10, 2048  ;;  %p488_p6 = scmp.lt.s32.totalorder %s43_s10, %s43_s10 }
  0x2b   :  { %p484_p5 = scmp.ne.s32.totalorder %s43_s10, %s483_s27  ;;  %p489_p7 = scmp.lt.s32.totalorder %s483_s27, %s483_s27 }
  0x2d   :  { %p490_p8 = por %p489_p7, %p488_p6 }
  0x2f   :  { %p491_p9 = pnand %p490_p8, %p484_p5 }
  0x31   :  { %494 = shalt.err (!%p491_p9)
}
  0x32   :  { %48 = dma.hbm_to_vmem [thread:$0]  %s641_s3, 2048, %s43_s10, [#allocation6], %s524_s28, %s524_s28, %s525_s29  }
  0x33   :  { %517 = dma.done.wait [#allocation3], 128  }
  0x34   :  { %518 = vsyncadd [#allocation3], 4294967168 }
  0x35   :  { %519 = dma.done.wait [#allocation6], 4096  }
  0x36   :  { %520 = vsyncadd [#allocation6], 4294963200  ;;  %v528_v0 = vmov 0.0|0.0   ;;  %vm529_vm0 = vmmov 0   ;;  %v530_v1 = vmov 0.0   ;;  %v61_v2 = vld [vmem:[#allocation5] sm:$0xff] }
  0x37   :  { %372 = vmatprep.subr.bf16.mxu0 %v528_v0  ;;  %334 = vmatprep.mubr.msk.f32.mxu0 %vm529_vm0, %v530_v1  ;;  %v62_v3 = vld [vmem:[#allocation5 + $0x8] sm:$0xff]  ;;  %v63_v4 = vld [vmem:[#allocation5 + $0x10] sm:$0xff]  ;;  %v64_v6 = vld [vmem:[#allocation5 + $0x18] sm:$0xff]  ;;  %s531_s7 = smov [#allocation8]  }
  0x38   :  { %396 = vmatprep.subr.bf16.mxu1 %v528_v0  ;;  %369 = vmatprep.mubr.msk.f32.mxu1 %vm529_vm0, %v530_v1  ;;  %v373_v5 = vpack.c.bf16 %v62_v3, %v61_v2  ;;  %v376_v7 = vpack.c.bf16 %v64_v6, %v63_v4  ;;  %v65_v8 = vld [vmem:[#allocation5 + $0x20] sm:$0xff]  ;;  %v66_v9 = vld [vmem:[#allocation5 + $0x28] sm:$0xff]  ;;  %v157_v12 = vld [vmem:[#allocation7 + $0x10] sm:$0xff]  ;;  %s256_s8 = sshll.u32 %s531_s7, 4  ;;  %s257_s8 = int_to_ptr.vmem [resolvable:$true] %s256_s8 }
  0x39   :  { %v155_v10 = vld [vmem:[#allocation7] sm:$0xff]  ;;  %v156_v11 = vld [vmem:[#allocation7 + $0x8] sm:$0xff]  ;;  %v158_v13 = vld [vmem:[#allocation7 + $0x18] sm:$0xff]  ;;  %v379_v14 = vpack.c.bf16 %v66_v9, %v65_v8  ;;  %s495_s9 = scalar_lea.vmem %s257_s8, 128  ;;  %p500_p11 = scmp.lt.s32.totalorder %s257_s8, %s257_s8 }
  0x3a   :  { %374 = vmatpush3.bf16.msra.mxu0 %v373_v5  ;;  %v397_v15 = vpack.c.bf16 %v156_v11, %v155_v10  ;;  %v67_v16 = vld [vmem:[#allocation5 + $0x30] sm:$0xff]  ;;  %v68_v17 = vld [vmem:[#allocation5 + $0x38] sm:$0xff]  ;;  %v400_v18 = vpack.c.bf16 %v158_v13, %v157_v12  ;;  %v159_v19 = vld [vmem:[#allocation7 + $0x20] sm:$0xff]  ;;  %p496_p10 = scmp.ne.s32.totalorder %s257_s8, %s495_s9  ;;  %p501_p12 = scmp.lt.s32.totalorder %s495_s9, %s495_s9 }
  0x3b   :  { %375 = vmatprep.subr.bf16.mxu0 %v528_v0  ;;  %v160_v20 = vld [vmem:[#allocation7 + $0x28] sm:$0xff]  ;;  %v382_v21 = vpack.c.bf16 %v68_v17, %v67_v16  ;;  %v69_v22 = vld [vmem:[#allocation5 + $0x40] sm:$0xff]  ;;  %v161_v25 = vld [vmem:[#allocation7 + $0x30] sm:$0xff] }
  0x3c   :  { %398 = vmatpush3.bf16.msra.mxu1 %v397_v15  ;;  %v70_v23 = vld [vmem:[#allocation5 + $0x48] sm:$0xff]  ;;  %v403_v24 = vpack.c.bf16 %v160_v20, %v159_v19  ;;  %v162_v26 = vld [vmem:[#allocation7 + $0x38] sm:$0xff]  ;;  %v71_v28 = vld [vmem:[#allocation5 + $0x50] sm:$0xff]  ;;  %p502_p13 = por %p501_p12, %p500_p11 }
  0x3d   :  { %399 = vmatprep.subr.bf16.mxu1 %v528_v0  ;;  %v385_v27 = vpack.c.bf16 %v70_v23, %v69_v22  ;;  %v72_v29 = vld [vmem:[#allocation5 + $0x58] sm:$0xff]  ;;  %v406_v30 = vpack.c.bf16 %v162_v26, %v161_v25  ;;  %v163_v31 = vld [vmem:[#allocation7 + $0x40] sm:$0xff]  ;;  %v164_v32 = vld [vmem:[#allocation7 + $0x48] sm:$0xff] }
  0x3e   :  { %377 = vmatpush3.bf16.msra.mxu0 %v376_v7  ;;  %v388_v33 = vpack.c.bf16 %v72_v29, %v71_v28  ;;  %v73_v34 = vld [vmem:[#allocation5 + $0x60] sm:$0xff]  ;;  %v74_v35 = vld [vmem:[#allocation5 + $0x68] sm:$0xff]  ;;  %v409_v36 = vpack.c.bf16 %v164_v32, %v163_v31  ;;  %v165_v37 = vld [vmem:[#allocation7 + $0x50] sm:$0xff]  ;;  %p503_p0 = pnand %p502_p13, %p496_p10 }
  0x3f   :  { %378 = vmatprep.subr.bf16.mxu0 %v528_v0  ;;  %v166_v38 = vld [vmem:[#allocation7 + $0x58] sm:$0xff]  ;;  %v391_v39 = vpack.c.bf16 %v74_v35, %v73_v34  ;;  %v75_v40 = vld [vmem:[#allocation5 + $0x70] sm:$0xff]  ;;  %v167_v43 = vld [vmem:[#allocation7 + $0x60] sm:$0xff] }
  0x40   :  { %401 = vmatpush3.bf16.msra.mxu1 %v400_v18  ;;  %v76_v41 = vld [vmem:[#allocation5 + $0x78] sm:$0xff]  ;;  %v412_v42 = vpack.c.bf16 %v166_v38, %v165_v37  ;;  %v168_v44 = vld [vmem:[#allocation7 + $0x68] sm:$0xff]  ;;  %v169_v48 = vld [vmem:[#allocation7 + $0x70] sm:$0xff] }
  0x41   :  { %402 = vmatprep.subr.bf16.mxu1 %v528_v0  ;;  %v394_v45 = vpack.c.bf16 %v76_v41, %v75_v40  ;;  %v415_v46 = vpack.c.bf16 %v168_v44, %v167_v43  ;;  %v60_v47 = vld [vmem:[#allocation2] sm:$0xff] }
  0x42   :  { %380 = vmatpush3.bf16.msra.mxu0 %v379_v14  ;;  %v170_v49 = vld [vmem:[#allocation7 + $0x78] sm:$0xff] }
  0x43   :  { %381 = vmatprep.subr.bf16.mxu0 %v528_v0  ;;  %v418_v50 = vpack.c.bf16 %v170_v49, %v169_v48  ;;  %v266_v51 = vld [vmem:[%s640_s2] ss:$0 sm:$0xff] }
  0x44   :  { %404 = vmatpush3.bf16.msra.mxu1 %v403_v24  ;;  %v267_v56 = vld [vmem:[%s642_s4] ss:$0 sm:$0xff] }
  0x45   :  { %405 = vmatprep.subr.bf16.mxu1 %v528_v0 }
  0x46   :  { %383 = vmatpush3.bf16.msra.mxu0 %v382_v21 }
  0x47   :  { %384 = vmatprep.subr.bf16.mxu0 %v528_v0 }
  0x48   :  { %407 = vmatpush3.bf16.msra.mxu1 %v406_v30 }
  0x49   :  { %408 = vmatprep.subr.bf16.mxu1 %v528_v0 }
  0x4a   :  { %386 = vmatpush3.bf16.msra.mxu0 %v385_v27 }
  0x4b   :  { %387 = vmatprep.subr.bf16.mxu0 %v528_v0 }
  0x4c   :  { %410 = vmatpush3.bf16.msra.mxu1 %v409_v36 }
  0x4d   :  { %411 = vmatprep.subr.bf16.mxu1 %v528_v0 }
  0x4e   :  { %389 = vmatpush3.bf16.msra.mxu0 %v388_v33 }
  0x4f   :  { %390 = vmatprep.subr.bf16.mxu0 %v528_v0 }
  0x50   :  { %413 = vmatpush3.bf16.msra.mxu1 %v412_v42 }
  0x51   :  { %414 = vmatprep.subr.bf16.mxu1 %v528_v0 }
  0x52   :  { %392 = vmatpush3.bf16.msra.mxu0 %v391_v39 }
  0x53   :  { %393 = vmatprep.subr.bf16.mxu0 %v528_v0 }
  0x54   :  { %416 = vmatpush3.bf16.msra.mxu1 %v415_v46 }
  0x55   :  { %417 = vmatprep.subr.bf16.mxu1 %v528_v0 }
  0x56   :  { %395 = vmatpush3.bf16.msra.mxu0 %v394_v45 }
  0x58   :  { %419 = vmatpush3.bf16.msra.mxu1 %v418_v50 }
  0x59   :  { %335 = vmatmul.mubr.f32.vlgmr.msra.gmra.mrb[0].mxu0 %v60_v47 }
 0x12c   :  { %v150_v52 = vpop.f32.mrb[0].mxu0 }
 0x12d   :  { %v151_v53 = vadd.f32 %v266_v51, %v150_v52  ;;  %v336_v54 = vpop.f32.mrb[1].mxu0 }
 0x12f   :  { %v154_v55 = vmax.f32 %v151_v53, 0.0 }
 0x131   :  { %370 = vmatmul.mubr.f32.vlgmr.msra.gmra.mrb[0].mxu1 %v154_v55 }
 0x204   :  { %v244_v57 = vpop.f32.mrb[0].mxu1 }
 0x205   :  { %v245_v58 = vadd.f32 %v267_v56, %v244_v57  ;;  %v371_v59 = vpop.f32.mrb[1].mxu1 }
 0x207   :  { %v248_v60 = vmax.f32 %v245_v58, 0.0 }
 0x209   :  { %249 = vst [vmem:[#allocation8] sm:$0xff] %v248_v60 }
 0x20a   :  { %506 = shalt.err (!%p503_p0)
}
 0x20b   :  { %s507_s11 = scalar_lea.hbm %s643_s5, 128 }
 0x20c   :  { %p508_p1 = scmp.ne.s32.totalorder %s643_s5, %s507_s11  ;;  %p511_p2 = scmp.lt.u32.totalorder %s507_s11, %s643_s5 }
 0x20e   :  { %p513_p3 = pnand %p511_p2, %p508_p1 }
 0x210   :  { %516 = shalt.err (!%p513_p3)
}
 0x211   :  { %259 = dma.vmem_to_hbm [thread:$0]  %s257_s8, 128, %s643_s5, [#allocation4]  }
 0x212   :  { %521 = dma.done.wait [#allocation4], 128  }
 0x213   :  { %522 = vsyncadd [#allocation4], 4294967168 }
 0x214   :  { %263 = vsyncpa [#allocation3], 1 }
 0x215   :  { %264 = vsyncpa [#allocation6], 1 }
 0x216   :  { %265 = vsyncpa [#allocation4], 1 }

</bundles_post_ra>
